<compile_context>
chip_gen: v6e
topology: v6e:2x2x1
jax: 0.10.0
libtpu: 0.0.40
codegen_flags: <defaults>
</compile_context>

<pallas_src>
import functools

import jax
import jax.numpy as jnp
from jax.experimental import pallas as pl
from jax.experimental.pallas import tpu as pltpu


def _mish(x):
    # mish(x) = x * tanh(softplus(x)) = x * (e^2 + 2e) / (e^2 + 2e + 2), e = exp(x).
    # Clamp before exp to avoid f32 overflow; for x >= 30 the ratio is ~1 anyway.
    e = jnp.exp(jnp.minimum(x, 30.0))
    n = e * (e + 2.0)
    return x * n * pl.reciprocal(n + 2.0, approx=True)


def resnet_block_kernel(x_ref, t_ref,
                        w1r_ref, b1r_ref,
                        wt_ref, bt_ref,
                        w2_ref, b2_ref,
                        o_ref, *, n_out):
    x = x_ref[...]            # (tm, Dp)  f32
    t = t_ref[...]            # (tm, Tp)  f32

    # Fused block1 + residual projection: one lane-dense matmul against [W1 | Wr].
    hr = jnp.dot(x.astype(jnp.bfloat16), w1r_ref[...],
                 preferred_element_type=jnp.float32) + b1r_ref[...]
    h = _mish(hr[:, :n_out])
    res = hr[:, n_out:]

    # mlp: Mish -> Linear(time_emb_dim -> dim_out)
    temb = jnp.dot(_mish(t).astype(jnp.bfloat16), wt_ref[...],
                   preferred_element_type=jnp.float32) + bt_ref[...]
    h = h + temb

    # block2: Linear(dim_out -> dim_out) + Mish
    h = jnp.dot(h.astype(jnp.bfloat16), w2_ref[...],
                preferred_element_type=jnp.float32) + b2_ref[...]
    h = _mish(h)

    o_ref[...] = (h + res).astype(o_ref.dtype)


def _round_up(n, m):
    return (n + m - 1) // m * m


def _pad2(a, rows, cols):
    r, c = a.shape
    return jnp.pad(a, ((0, rows - r), (0, cols - c)))


def resnet_block(x, time_emb, params, tm=256):
    B, dim = x.shape
    _, tdim = time_emb.shape
    dim_out = params["w1"].shape[1]

    # Lane-dense padded feature dims (multiples of 128) and batch tiling.
    Dp = _round_up(dim, 128)
    Tp = _round_up(tdim, 128)
    Np = _round_up(dim_out, 128)
    tm = min(tm, _round_up(B, 8))
    Bp = _round_up(B, tm)

    xp = _pad2(x, Bp, Dp)
    tp = _pad2(time_emb, Bp, Tp)

    # Fused [W1 | Wr] weight (bf16) and [b1 | br] bias (f32).
    w1r = jnp.concatenate([_pad2(params["w1"], Dp, Np),
                           _pad2(params["wr"], Dp, Np)], axis=1).astype(jnp.bfloat16)
    b1r = jnp.concatenate([_pad2(params["b1"], 1, Np),
                           _pad2(params["br"], 1, Np)], axis=1)
    wt = _pad2(params["wt"], Tp, Np).astype(jnp.bfloat16)
    bt = _pad2(params["bt"], 1, Np)
    w2 = _pad2(params["w2"], Np, Np).astype(jnp.bfloat16)
    b2 = _pad2(params["b2"], 1, Np)

    kernel = functools.partial(resnet_block_kernel, n_out=Np)

    out = pl.pallas_call(
        kernel,
        out_shape=jax.ShapeDtypeStruct((Bp, Np), jnp.float32),
        grid_spec=pltpu.PrefetchScalarGridSpec(
            num_scalar_prefetch=0,
            grid=(Bp // tm,),
            in_specs=[
                pl.BlockSpec((tm, Dp), lambda i: (i, 0)),        # x tile
                pl.BlockSpec((tm, Tp), lambda i: (i, 0)),        # time_emb tile
                pl.BlockSpec((Dp, 2 * Np), lambda i: (0, 0)),    # [W1 | Wr]   (resident)
                pl.BlockSpec((1, 2 * Np), lambda i: (0, 0)),     # [b1 | br]
                pl.BlockSpec((Tp, Np), lambda i: (0, 0)),        # Wt
                pl.BlockSpec((1, Np), lambda i: (0, 0)),         # bt
                pl.BlockSpec((Np, Np), lambda i: (0, 0)),        # W2
                pl.BlockSpec((1, Np), lambda i: (0, 0)),         # b2
            ],
            out_specs=pl.BlockSpec((tm, Np), lambda i: (i, 0)),
        ),
        compiler_params=pltpu.CompilerParams(
            dimension_semantics=("parallel",)),
    )(xp, tp, w1r, b1r, wt, bt, w2, b2)

    return out[:B, :dim_out]


def _init_linear(key, fan_in, fan_out):
    # Mirrors torch.nn.Linear default init: U(-1/sqrt(fan_in), 1/sqrt(fan_in)).
    kw, kb = jax.random.split(key)
    bound = 1.0 / jnp.sqrt(fan_in)
    w = jax.random.uniform(kw, (fan_in, fan_out), jnp.float32, -bound, bound)
    b = jax.random.uniform(kb, (1, fan_out), jnp.float32, -bound, bound)
    return w, b


def _reference(x, t, p):
    def mish(v):
        return v * jnp.tanh(jax.nn.softplus(v))
    h = mish(x @ p["w1"] + p["b1"])
    h = h + (mish(t) @ p["wt"] + p["bt"])
    h = mish(h @ p["w2"] + p["b2"])
    return h + (x @ p["wr"] + p["br"])


if __name__ == "__main__":
    B, dim, dim_out, time_emb_dim = 24, 32, 64, 16

    key = jax.random.PRNGKey(0)
    k_x, k_t, k1, k2, k3, k4 = jax.random.split(key, 6)

    x = jax.random.normal(k_x, (B, dim), jnp.float32)
    time_emb = jax.random.normal(k_t, (B, time_emb_dim), jnp.float32)

    w1, b1 = _init_linear(k1, dim, dim_out)           # block1
    wt, bt = _init_linear(k2, time_emb_dim, dim_out)  # mlp
    w2, b2 = _init_linear(k3, dim_out, dim_out)       # block2
    wr, br = _init_linear(k4, dim, dim_out)           # res_conv (dim != dim_out)

    params = dict(w1=w1, b1=b1, wt=wt, bt=bt, w2=w2, b2=b2, wr=wr, br=br)

    # Small tm so the batch grid has several steps (exercises tiling/pipelining).
    out = resnet_block(x, time_emb, params, tm=8)
    out = jax.block_until_ready(out)

    ref = _reference(x, time_emb, params)
    assert out.shape == (B, dim_out)
    # bf16 matmul operands + approx reciprocal in Mish -> relaxed tolerance vs f32 ref.
    assert jnp.allclose(out, ref, atol=5e-2, rtol=5e-2), "mismatch vs reference"

    print("KERNEL_OK")
</pallas_src>

<mosaic_0001>
module attributes {stable_mosaic.version = 11 : i64} {
  func.func @resnet_block_kernel(%arg0: i32, %arg1: memref<8x128xf32, #tpu.memory_space<vmem>>, %arg2: memref<8x128xf32, #tpu.memory_space<vmem>>, %arg3: memref<128x256xbf16, #tpu.memory_space<vmem>>, %arg4: memref<1x256xf32, #tpu.memory_space<vmem>>, %arg5: memref<128x128xbf16, #tpu.memory_space<vmem>>, %arg6: memref<1x128xf32, #tpu.memory_space<vmem>>, %arg7: memref<128x128xbf16, #tpu.memory_space<vmem>>, %arg8: memref<1x128xf32, #tpu.memory_space<vmem>>, %arg9: memref<8x128xf32, #tpu.memory_space<vmem>>) attributes {dimension_semantics = [#tpu.dimension_semantics<parallel>], iteration_bounds = array<i64: 3>, scalar_prefetch = 0 : i64, scratch_operands = 0 : i64, tpu.core_type = #tpu.core_type<tc>, window_params = [{transform_indices = @transform_0, window_bounds = array<i64: 8, 128>}, {transform_indices = @transform_1, window_bounds = array<i64: 8, 128>}, {pipeline_mode = #tpu.pipeline_mode<synchronous>, transform_indices = @transform_2, window_bounds = array<i64: 128, 256>}, {pipeline_mode = #tpu.pipeline_mode<synchronous>, transform_indices = @transform_3, window_bounds = array<i64: 1, 256>}, {pipeline_mode = #tpu.pipeline_mode<synchronous>, transform_indices = @transform_4, window_bounds = array<i64: 128, 128>}, {pipeline_mode = #tpu.pipeline_mode<synchronous>, transform_indices = @transform_5, window_bounds = array<i64: 1, 128>}, {pipeline_mode = #tpu.pipeline_mode<synchronous>, transform_indices = @transform_6, window_bounds = array<i64: 128, 128>}, {pipeline_mode = #tpu.pipeline_mode<synchronous>, transform_indices = @transform_7, window_bounds = array<i64: 1, 128>}, {transform_indices = @transform_8, window_bounds = array<i64: 8, 128>}]} {
    %c0 = arith.constant 0 : index
    %c0_0 = arith.constant 0 : index
    %0 = vector.load %arg1[%c0, %c0_0] : memref<8x128xf32, #tpu.memory_space<vmem>>, vector<8x128xf32>
    %c0_1 = arith.constant 0 : index
    %c0_2 = arith.constant 0 : index
    %1 = vector.load %arg2[%c0_1, %c0_2] : memref<8x128xf32, #tpu.memory_space<vmem>>, vector<8x128xf32>
    %2 = arith.truncf %0 : vector<8x128xf32> to vector<8x128xbf16>
    %c0_3 = arith.constant 0 : index
    %c0_4 = arith.constant 0 : index
    %3 = vector.load %arg3[%c0_3, %c0_4] : memref<128x256xbf16, #tpu.memory_space<vmem>>, vector<128x256xbf16>
    %cst = arith.constant dense<0.000000e+00> : vector<8x256xf32>
    %4 = tpu.matmul %2, %3, %cst {dimension_numbers = #tpu.dot_dimension_numbers<[1], [0], [0], [1], [0, 0, 1, 1], [], []>} : vector<8x128xbf16>, vector<128x256xbf16>, vector<8x256xf32> -> vector<8x256xf32>
    %c0_5 = arith.constant 0 : index
    %c0_6 = arith.constant 0 : index
    %5 = vector.load %arg4[%c0_5, %c0_6] : memref<1x256xf32, #tpu.memory_space<vmem>>, vector<1x256xf32>
    %6 = vector.broadcast %5 : vector<1x256xf32> to vector<8x256xf32>
    %7 = arith.addf %4, %6 : vector<8x256xf32>
    %8 = vector.extract_strided_slice %7 {offsets = [0, 0], sizes = [8, 128], strides = [1, 1]} : vector<8x256xf32> to vector<8x128xf32>
    %cst_7 = arith.constant 3.000000e+01 : f32
    %9 = vector.broadcast %cst_7 : f32 to vector<8x128xf32>
    %10 = arith.minimumf %8, %9 : vector<8x128xf32>
    %11 = math.exp %10 : vector<8x128xf32>
    %cst_8 = arith.constant 2.000000e+00 : f32
    %12 = vector.broadcast %cst_8 : f32 to vector<8x128xf32>
    %13 = arith.addf %11, %12 : vector<8x128xf32>
    %14 = arith.mulf %11, %13 : vector<8x128xf32>
    %15 = arith.mulf %8, %14 : vector<8x128xf32>
    %cst_9 = arith.constant 2.000000e+00 : f32
    %16 = vector.broadcast %cst_9 : f32 to vector<8x128xf32>
    %17 = arith.addf %14, %16 : vector<8x128xf32>
    %18 = tpu.reciprocal %17 {approx = true} : vector<8x128xf32> -> vector<8x128xf32>
    %19 = arith.mulf %15, %18 : vector<8x128xf32>
    %20 = vector.extract_strided_slice %7 {offsets = [0, 128], sizes = [8, 128], strides = [1, 1]} : vector<8x256xf32> to vector<8x128xf32>
    %cst_10 = arith.constant 3.000000e+01 : f32
    %21 = vector.broadcast %cst_10 : f32 to vector<8x128xf32>
    %22 = arith.minimumf %1, %21 : vector<8x128xf32>
    %23 = math.exp %22 : vector<8x128xf32>
    %cst_11 = arith.constant 2.000000e+00 : f32
    %24 = vector.broadcast %cst_11 : f32 to vector<8x128xf32>
    %25 = arith.addf %23, %24 : vector<8x128xf32>
    %26 = arith.mulf %23, %25 : vector<8x128xf32>
    %27 = arith.mulf %1, %26 : vector<8x128xf32>
    %cst_12 = arith.constant 2.000000e+00 : f32
    %28 = vector.broadcast %cst_12 : f32 to vector<8x128xf32>
    %29 = arith.addf %26, %28 : vector<8x128xf32>
    %30 = tpu.reciprocal %29 {approx = true} : vector<8x128xf32> -> vector<8x128xf32>
    %31 = arith.mulf %27, %30 : vector<8x128xf32>
    %32 = arith.truncf %31 : vector<8x128xf32> to vector<8x128xbf16>
    %c0_13 = arith.constant 0 : index
    %c0_14 = arith.constant 0 : index
    %33 = vector.load %arg5[%c0_13, %c0_14] : memref<128x128xbf16, #tpu.memory_space<vmem>>, vector<128x128xbf16>
    %cst_15 = arith.constant dense<0.000000e+00> : vector<8x128xf32>
    %34 = tpu.matmul %32, %33, %cst_15 {dimension_numbers = #tpu.dot_dimension_numbers<[1], [0], [0], [1], [0, 0, 1, 1], [], []>} : vector<8x128xbf16>, vector<128x128xbf16>, vector<8x128xf32> -> vector<8x128xf32>
    %c0_16 = arith.constant 0 : index
    %c0_17 = arith.constant 0 : index
    %35 = vector.load %arg6[%c0_16, %c0_17] : memref<1x128xf32, #tpu.memory_space<vmem>>, vector<1x128xf32>
    %36 = vector.broadcast %35 : vector<1x128xf32> to vector<8x128xf32>
    %37 = arith.addf %34, %36 : vector<8x128xf32>
    %38 = arith.addf %19, %37 : vector<8x128xf32>
    %39 = arith.truncf %38 : vector<8x128xf32> to vector<8x128xbf16>
    %c0_18 = arith.constant 0 : index
    %c0_19 = arith.constant 0 : index
    %40 = vector.load %arg7[%c0_18, %c0_19] : memref<128x128xbf16, #tpu.memory_space<vmem>>, vector<128x128xbf16>
    %cst_20 = arith.constant dense<0.000000e+00> : vector<8x128xf32>
    %41 = tpu.matmul %39, %40, %cst_20 {dimension_numbers = #tpu.dot_dimension_numbers<[1], [0], [0], [1], [0, 0, 1, 1], [], []>} : vector<8x128xbf16>, vector<128x128xbf16>, vector<8x128xf32> -> vector<8x128xf32>
    %c0_21 = arith.constant 0 : index
    %c0_22 = arith.constant 0 : index
    %42 = vector.load %arg8[%c0_21, %c0_22] : memref<1x128xf32, #tpu.memory_space<vmem>>, vector<1x128xf32>
    %43 = vector.broadcast %42 : vector<1x128xf32> to vector<8x128xf32>
    %44 = arith.addf %41, %43 : vector<8x128xf32>
    %cst_23 = arith.constant 3.000000e+01 : f32
    %45 = vector.broadcast %cst_23 : f32 to vector<8x128xf32>
    %46 = arith.minimumf %44, %45 : vector<8x128xf32>
    %47 = math.exp %46 : vector<8x128xf32>
    %cst_24 = arith.constant 2.000000e+00 : f32
    %48 = vector.broadcast %cst_24 : f32 to vector<8x128xf32>
    %49 = arith.addf %47, %48 : vector<8x128xf32>
    %50 = arith.mulf %47, %49 : vector<8x128xf32>
    %51 = arith.mulf %44, %50 : vector<8x128xf32>
    %cst_25 = arith.constant 2.000000e+00 : f32
    %52 = vector.broadcast %cst_25 : f32 to vector<8x128xf32>
    %53 = arith.addf %50, %52 : vector<8x128xf32>
    %54 = tpu.reciprocal %53 {approx = true} : vector<8x128xf32> -> vector<8x128xf32>
    %55 = arith.mulf %51, %54 : vector<8x128xf32>
    %56 = arith.addf %55, %20 : vector<8x128xf32>
    %c0_26 = arith.constant 0 : index
    %c0_27 = arith.constant 0 : index
    %57 = vector.load %arg9[%c0_26, %c0_27] : memref<8x128xf32, #tpu.memory_space<vmem>>, vector<8x128xf32>
    tpu.vector_store %arg9[%c0_26, %c0_27], %56 {strides = array<i32>} : memref<8x128xf32, #tpu.memory_space<vmem>>, vector<8x128xf32>,
    return
  }
  func.func @transform_0(%arg0: i32) -> (i32, i32) {
    %c0_i32 = arith.constant 0 : i32
    %c0_i32_0 = arith.constant 0 : i32
    return %arg0, %c0_i32 : i32, i32
  }
  func.func @transform_1(%arg0: i32) -> (i32, i32) {
    %c0_i32 = arith.constant 0 : i32
    %c0_i32_0 = arith.constant 0 : i32
    return %arg0, %c0_i32 : i32, i32
  }
  func.func @transform_2(%arg0: i32) -> (i32, i32) {
    %c0_i32 = arith.constant 0 : i32
    %c0_i32_0 = arith.constant 0 : i32
    %c0_i32_1 = arith.constant 0 : i32
    return %c0_i32, %c0_i32_0 : i32, i32
  }
  func.func @transform_3(%arg0: i32) -> (i32, i32) {
    %c0_i32 = arith.constant 0 : i32
    %c0_i32_0 = arith.constant 0 : i32
    %c0_i32_1 = arith.constant 0 : i32
    return %c0_i32, %c0_i32_0 : i32, i32
  }
  func.func @transform_4(%arg0: i32) -> (i32, i32) {
    %c0_i32 = arith.constant 0 : i32
    %c0_i32_0 = arith.constant 0 : i32
    %c0_i32_1 = arith.constant 0 : i32
    return %c0_i32, %c0_i32_0 : i32, i32
  }
  func.func @transform_5(%arg0: i32) -> (i32, i32) {
    %c0_i32 = arith.constant 0 : i32
    %c0_i32_0 = arith.constant 0 : i32
    %c0_i32_1 = arith.constant 0 : i32
    return %c0_i32, %c0_i32_0 : i32, i32
  }
  func.func @transform_6(%arg0: i32) -> (i32, i32) {
    %c0_i32 = arith.constant 0 : i32
    %c0_i32_0 = arith.constant 0 : i32
    %c0_i32_1 = arith.constant 0 : i32
    return %c0_i32, %c0_i32_0 : i32, i32
  }
  func.func @transform_7(%arg0: i32) -> (i32, i32) {
    %c0_i32 = arith.constant 0 : i32
    %c0_i32_0 = arith.constant 0 : i32
    %c0_i32_1 = arith.constant 0 : i32
    return %c0_i32, %c0_i32_0 : i32, i32
  }
  func.func @transform_8(%arg0: i32) -> (i32, i32) {
    %c0_i32 = arith.constant 0 : i32
    %c0_i32_0 = arith.constant 0 : i32
    return %arg0, %c0_i32 : i32, i32
  }
}

</mosaic_0001>

<bundles_post_ra>
// kernel: tpu_custom_call.1
= control target key start
LH: loop header
LB: loop body
LE: loop exit
PB: predicated region body
PF: predicated region fallthrough
CT: control target
= control target key end

     0   :  { %s1719_s0 = inlined_call_operand.hbm [shape: f32[24,128], index: 0, kind: input, shape index: {}]   ;;  %s1720_s1 = inlined_call_operand.hbm [shape: f32[24,128], index: 1, kind: input, shape index: {}]   ;;  %s1721_s2 = inlined_call_operand.hbm [shape: bf16[128,256], index: 2, kind: input, shape index: {}]   ;;  %s1722_s3 = inlined_call_operand.vmem [shape: f32[1,256], index: 3, kind: input, shape index: {}]   ;;  %s1723_s4 = inlined_call_operand.hbm [shape: bf16[128,128], index: 4, kind: input, shape index: {}]   ;;  %s1724_s5 = inlined_call_operand.vmem [shape: f32[1,128], index: 5, kind: input, shape index: {}]   ;;  %s1725_s6 = inlined_call_operand.hbm [shape: bf16[128,128], index: 6, kind: input, shape index: {}]   ;;  %s1726_s7 = inlined_call_operand.vmem [shape: f32[1,128], index: 7, kind: input, shape index: {}]   ;;  %s1727_s8 = inlined_call_operand.hbm [shape: f32[24,128], index: 8, kind: output, shape index: {}]  }
   0x1   :  { %1733 = sst [smem:[#allocation19_spill]] %s1721_s2 }
   0x2   :  { %1734 = sst [smem:[#allocation20_spill]] %s1723_s4 }
   0x3   :  { %1735 = sst [smem:[#allocation21_spill]] %s1725_s6 }
   0x4   :  { %13 = vsyncpa [#allocation3], 0 }
   0x5   :  { %15 = vsyncpa [#allocation3 + $0x1], 0 }
   0x6   :  { %16 = vsyncpa [#allocation6], 0 }
   0x7   :  { %18 = vsyncpa [#allocation6 + $0x1], 0 }
   0x8   :  { %19 = vsyncpa [#allocation9], 0 }
   0x9   :  { %20 = vsyncpa [#allocation4], 0 }
   0xa   :  { %22 = vsyncpa [#allocation4 + $0x1], 0  ;;  %s1467_s27 = smov 0   ;;  %s1469_s28 = smov 0  }
   0xb   :  { %s1471_s29 = smov 0   ;;  %s1473_s30 = smov 0  }
   0xc LB: > { %1736 = sst [smem:[#allocation17_spill]] %s1403_s29  ;;  %s1488_s9 = sadd.s32 4294967295, %s1407_s30   ;;  %s1407_s30 = sphi %s1473_s30, %s1760_s30   ;;  %s1403_s29 = sphi %s1471_s29, %s1757_s29   ;;  %s1399_s28 = sphi %s1469_s28, %s1759_s28   ;;  %s1395_s27 = sphi %s1467_s27, %s1758_s27  }
   0xd   : > { %s943_s10 = sadd.s32 4294967294, %s1407_s30   ;;  %p48_p0 = scmp.ne.s32.totalorder %s1399_s28, %s1395_s27 }
   0xe   : > { %p1728_p1 = scmp.eq.s32.totalorder %s1488_s9, 0  ;;  %p230_p3 = scmp.eq.s32.totalorder %s943_s10, 2 }
   0xf   : > { %p944_p5 = scmp.ge.s32.totalorder %s1407_s30, 1  ;;  %p237_p7 = scmp.lt.s32.totalorder %s1407_s30, 4 }
  0x10   : > { %p1497_p4 = por %p1728_p1, %p48_p0  ;;  %p1502_p6 = por %p230_p3, %p48_p0 }
  0x11   : > { %p1507_p8 = pnand %p944_p5, %p237_p7  ;;  %s1409_s14 = smov [#allocation7]  }
  0x12   : > { %s1737_s11 = scalar_select %p1497_p4, 1, 0 }
  0x13   : > { %s1738_s12 = scalar_select %p1502_p6, 1, 0 }
  0x14   : > { %s1739_s13 = scalar_select %p1507_p8, 1, 0 }
  0x15   : > { %s249_s15 = sshll.u32 %s1409_s14, 4  ;;  %p1074_p9 = pneg %p1507_p8  ;;  %s250_s15 = int_to_ptr.vmem [resolvable:$true] %s249_s15 }
  0x16   : > { %s1410_s17 = smov [#allocation8]   ;;  %s1208_s19 = scalar_lea.vmem %s250_s15, 2048 }
  0x17   : > { %p1515_p10 = pnand %p1074_p9, %p1728_p1  ;;  %s265_s18 = sshll.u32 %s1410_s17, 4  ;;  %s266_s18 = int_to_ptr.vmem [resolvable:$true] %s265_s18 }
  0x18   : > { %p1209_p12 = scmp.ne.s32.totalorder %s250_s15, %s1208_s19  ;;  %p1216_p3 = scmp.lt.s32.totalorder %s250_s15, %s250_s15 }
  0x19   : > { %p1199_p11 = pneg %p1515_p10  ;;  %p1217_p5 = scmp.lt.s32.totalorder %s1208_s19, %s1208_s19 }
  0x1b   : > { %p1211_p13 = pnand %p1209_p12, %p1199_p11  ;;  %p1218_p7 = por %p1217_p5, %p1216_p3 }
  0x1d   : > { %p1212_p0 = pneg %p1211_p13 }
  0x1f   : > { %p1219_p9 = pnand %p1218_p7, %p1212_p0 }
  0x21   : > { %1222 = shalt.err (!%p1219_p9)
}
  0x22   : > { %s1411_s20 = smov 128   ;;  %s1412_s21 = smov 8  }
  0x23   : > { %s1741_s2 = sld [smem:[#allocation19_spill]]  ;;  %s1234_s24 = scalar_lea.vmem %s266_s18, 1024 }
  0x24   : > { %p1235_p1 = scmp.ne.s32.totalorder %s266_s18, %s1234_s24  ;;  %p1242_p2 = scmp.lt.s32.totalorder %s266_s18, %s266_s18 }
  0x25   : > { %p1243_p6 = scmp.lt.s32.totalorder %s1234_s24, %s1234_s24 }
  0x26   : > { %p1237_p12 = pnand %p1235_p1, %p1199_p11 }
  0x27   : > { %p1244_p3 = por %p1243_p6, %p1242_p2 }
  0x28   : > { %p1238_p13 = pneg %p1237_p12 }
  0x29   : > { %1077 = dma.hbm_to_vmem [thread:$0]  (!%p1515_p10), %s1741_s2, 2048, %s250_s15, [#allocation6], %s1411_s20, %s1411_s20, %s1412_s21  }
  0x2a   : > { %p1245_p0 = pnand %p1244_p3, %p1238_p13 }
  0x2c   : > { %1248 = shalt.err (!%p1245_p0)
}
  0x2d   : > { %s1413_s25 = smov 64   ;;  %s1414_s26 = smov 4  }
  0x2e   : > { %s1742_s4 = sld [smem:[#allocation20_spill]]  ;;  %s1415_s15 = smov [#allocation10]  }
  0x2f   : > { %s281_s17 = sshll.u32 %s1415_s15, 4  ;;  %s1538_s19 = sadd.s32 1, %s1407_s30   ;;  %s282_s17 = int_to_ptr.vmem [resolvable:$true] %s281_s17 }
  0x30   : > { %s1260_s20 = scalar_lea.vmem %s282_s17, 1024  ;;  %p1268_p5 = scmp.lt.s32.totalorder %s282_s17, %s282_s17 }
  0x31   : > { %p1261_p1 = scmp.ne.s32.totalorder %s282_s17, %s1260_s20  ;;  %p1269_p7 = scmp.lt.s32.totalorder %s1260_s20, %s1260_s20 }
  0x33   : > { %p1263_p2 = pnand %p1261_p1, %p1199_p11  ;;  %p1270_p9 = por %p1269_p7, %p1268_p5 }
  0x34   : > { %1080 = dma.hbm_to_vmem [thread:$0]  (!%p1515_p10), %s1742_s4, 1024, %s266_s18, [#allocation9], %s1413_s25, %s1413_s25, %s1414_s26  }
  0x35   : > { %p1264_p6 = pneg %p1263_p2 }
  0x37   : > { %p1271_p12 = pnand %p1270_p9, %p1264_p6 }
  0x39   : > { %1274 = shalt.err (!%p1271_p12)
}
  0x3a   : > { %s1743_s6 = sld [smem:[#allocation21_spill]]  ;;  %s32_s22 = ssub.s32 %s1407_s30, %s1538_s19 }
  0x3b   : > { %s35_s23 = sadd.s32 1, %s1403_s29  ;;  %p33_p11 = scmp.eq.s32.totalorder %s32_s22, 0 }
  0x3c   : > { %p42_p13 = scmp.ne.s32.totalorder %s1403_s29, %s1399_s28  ;;  %p43_p3 = scmp.eq.s32.totalorder %s1407_s30, 0 }
  0x3d   : > { %p1098_p0 = scmp.lt.s32.totalorder %s1407_s30, 3  ;;  %p1745_p2 = scmp.eq.s32.totalorder %s1488_s9, 2 }
  0x3e   : > { %s1556_s16 = scalar_select %p33_p11, %s1403_s29, %s35_s23  }
  0x3f   : > { %p44_p1 = por %p43_p3, %p42_p13  ;;  %p1560_p6 = por %p1745_p2, %p42_p13 }
  0x40   : > { %1083 = dma.hbm_to_vmem [thread:$0]  (!%p1515_p10), %s1743_s6, 1024, %s282_s17, [#allocation9], %s1413_s25, %s1413_s25, %s1414_s26  }
  0x41   : > { %1744 = sst [smem:[#allocation18_spill]] %s1556_s16  ;;  %s298_s10 = sand.u32 1, %s1403_s29  }
  0x42   : > { %s1746_s24 = scalar_select %p1560_p6, 1, 0 }
  0x43   : > { %s950_s14 = sshll.u32 %s1407_s30, 7  ;;  %s1566_s15 = sshll.u32 %s298_s10, 3 }
  0x44   : > { %s1571_s26 = scalar_lea.hbm %s1719_s0, %s950_s14  ;;  %s302_s17 = scalar_lea.vmem [#allocation2], %s1566_s15 }
  0x45   : > { %s309_s21 = sshll.u32 %s302_s17, 4  ;;  %p1574_p10 = pnand %p1098_p0, %p44_p1  ;;  %s310_s21 = int_to_ptr.vmem [resolvable:$true] %s309_s21 }
  0x46   : > { %s1581_s2 = scalar_lea.hbm %s1720_s1, %s950_s14  ;;  %s299_s20 = scalar_lea.sflag [#allocation3], %s298_s10 }
  0x47   : > { %s1275_s25 = scalar_lea.hbm %s1571_s26, 128  ;;  %p1277_p7 = pneg %p1574_p10 }
  0x48   : > { %p1276_p5 = scmp.ne.s32.totalorder %s1571_s26, %s1275_s25  ;;  %s1280_s6 = scalar_lea.hbm %s1719_s0, 384 }
  0x49   : > { %p1281_p11 = scmp.lt.s32.totalorder %s1571_s26, %s1719_s0  ;;  %p1282_p13 = scmp.lt.s32.totalorder %s1280_s6, %s1275_s25 }
  0x4a   : > { %p1278_p9 = pnand %p1277_p7, %p1276_p5 }
  0x4b   : > { %p1283_p3 = por %p1282_p13, %p1281_p11 }
  0x4c   : > { %p1279_p12 = pneg %p1278_p9 }
  0x4e   : > { %p1284_p0 = pnand %p1283_p3, %p1279_p12 }
  0x50   : > { %1287 = shalt.err (!%p1284_p0)
}
  0x51   : > { %s1288_s10 = scalar_lea.vmem %s310_s21, 128  ;;  %s1416_s14 = smov [#allocation2]  }
  0x52   : > { %p1289_p1 = scmp.ne.s32.totalorder %s310_s21, %s1288_s10  ;;  %s1293_s22 = sshll.u32 %s1416_s14, 4  ;;  %s1294_s22 = int_to_ptr.vmem [resolvable:$false] %s1293_s22 }
  0x53   : > { %s1295_s4 = scalar_lea.vmem %s1294_s22, 256  ;;  %p1296_p9 = scmp.lt.s32.totalorder %s310_s21, %s1294_s22 }
  0x54   : > { %p1291_p2 = pnand %p1289_p1, %p1277_p7  ;;  %p1297_p6 = scmp.lt.s32.totalorder %s1295_s4, %s1288_s10 }
  0x56   : > { %p1292_p5 = pneg %p1291_p2  ;;  %p1298_p4 = por %p1297_p6, %p1296_p9 }
  0x58   : > { %p1299_p8 = pnand %p1298_p4, %p1292_p5 }
  0x5a   : > { %1302 = shalt.err (!%p1299_p8)
}
  0x5b   : > { %1087 = dma.hbm_to_vmem [thread:$0]  (!%p1574_p10), %s1571_s26, 128, %s310_s21, %s299_s20  }
  0x5c   : > { %s316_s6 = sand.u32 1, %s1407_s30   ;;  %s320_s29 = scalar_lea.vmem [#allocation5], %s1566_s15 }
  0x5d   : > { %s327_s16 = sshll.u32 %s320_s29, 4  ;;  %s317_s23 = scalar_lea.sflag [#allocation6], %s316_s6  ;;  %s328_s16 = int_to_ptr.vmem [resolvable:$true] %s327_s16 }
  0x5e   : > { %s1303_s25 = scalar_lea.hbm %s1581_s2, 128  ;;  %s1308_s14 = scalar_lea.hbm %s1720_s1, 384 }
  0x5f   : > { %p1304_p12 = scmp.ne.s32.totalorder %s1581_s2, %s1303_s25  ;;  %p1309_p6 = scmp.lt.s32.totalorder %s1581_s2, %s1720_s1 }
  0x60   : > { %p1310_p11 = scmp.lt.s32.totalorder %s1308_s14, %s1303_s25 }
  0x61   : > { %p1306_p4 = pnand %p1304_p12, %p1277_p7 }
  0x62   : > { %p1311_p13 = por %p1310_p11, %p1309_p6 }
  0x63   : > { %p1307_p8 = pneg %p1306_p4 }
  0x65   : > { %p1312_p3 = pnand %p1311_p13, %p1307_p8 }
  0x67   : > { %1315 = shalt.err (!%p1312_p3)
}
  0x68   : > { %s1316_s15 = scalar_lea.vmem %s328_s16, 128  ;;  %s1417_s26 = smov [#allocation5]  }
  0x69   : > { %p1317_p0 = scmp.ne.s32.totalorder %s328_s16, %s1316_s15  ;;  %s1321_s21 = sshll.u32 %s1417_s26, 4  ;;  %s1322_s21 = int_to_ptr.vmem [resolvable:$false] %s1321_s21 }
  0x6a   : > { %s1323_s20 = scalar_lea.vmem %s1322_s21, 256  ;;  %p1324_p5 = scmp.lt.s32.totalorder %s328_s16, %s1322_s21 }
  0x6b   : > { %p1319_p1 = pnand %p1317_p0, %p1277_p7  ;;  %p1325_p9 = scmp.lt.s32.totalorder %s1323_s20, %s1316_s15 }
  0x6d   : > { %p1320_p2 = pneg %p1319_p1  ;;  %p1326_p12 = por %p1325_p9, %p1324_p5 }
  0x6f   : > { %p1327_p4 = pnand %p1326_p12, %p1320_p2 }
  0x71   : > { %1330 = shalt.err (!%p1327_p4)
}
  0x72   : > { %1090 = dma.hbm_to_vmem [thread:$0]  (!%p1574_p10), %s1581_s2, 128, %s328_s16, %s317_s23  }
  0x73   : > { %p1748_p8 = scmp.ne.s32.totalorder %s1739_s13, 0 }
  0x74   : > { %s1626_s6 = sand.u32 (!%p1748_p8), 1, %s1399_s28   ;;  %p1749_p7 = scmp.ne.s32.totalorder (!%p1748_p8), %s1737_s11, 0 }
  0x75   : > { %336 = sbr.rel (%p1748_p8) target bundleno = 656 (0x290), region = 52  ;;  %s1629_s29 = sshll.u32 (!%p1748_p8), %s1626_s6, 3 }
  0x76   : > { %s339_s25 = scalar_lea.sflag (!%p1748_p8), [#allocation3], %s1626_s6  ;;  %s342_s17 = scalar_lea.vmem (!%p1748_p8), [#allocation2], %s1629_s29 }
  0x7a   : > { %1374 = dma.done.wait (%p1749_p7), %s339_s25, 128  }
  0x7b   : > { %1376 = vsyncadd (%p1749_p7), %s339_s25, 4294967168  ;;  %s347_s2 = sand.u32 1, %s1488_s9   ;;  %s351_s18 = scalar_lea.vmem [#allocation5], %s1629_s29 }
  0x7c   : > { %s348_s13 = scalar_lea.sflag [#allocation6], %s347_s2 }
  0x7d   : > { %1378 = dma.done.wait (%p1749_p7), %s348_s13, 128  }
  0x7e   : > { %1380 = vsyncadd (%p1749_p7), %s348_s13, 4294967168  ;;  %p1750_p10 = scmp.eq.s32.totalorder %s1488_s9, 0 }
  0x80   : > { %1382 = dma.done.wait (%p1750_p10), [#allocation6], 2048   ;;  %p1751_p6 = pmov %p1750_p10 }
  0x82   : > { %1384 = vsyncadd (%p1751_p6), [#allocation6], 4294965248  ;;  %p1752_p11 = pmov %p1751_p6 }
  0x83   : > { %p1753_p13 = pmov %p1751_p6 }
  0x84   : > { %1386 = dma.done.wait (%p1752_p11), [#allocation9], 2048  }
  0x85   : > { %1388 = vsyncadd (%p1753_p13), [#allocation9], 4294965248  ;;  %v1418_v0 = vmov 0   ;;  %v1419_v1 = vmov 0.0   ;;  %vm1420_vm0 = vmmov 0   ;;  %v1169_v10 = vld [vmem:[#allocation8 + $0x38] sm:$0xff]   ;;  %v423_v47 = vlaneseq }
  0x86   : > { %545 = vmatprep.mubr.bf16.mxu0 %v1418_v0  ;;  %1016 = vmatprep.subr.bf16.mxu1 %v1419_v1  ;;  %v1145_v2 = vld [vmem:[#allocation7 + $0x74] ss:$8 sps:$4 sm:$0xff]   ;;  %v1147_v3 = vld [vmem:[#allocation7 + $0x70] ss:$8 sps:$4 sm:$0xff]   ;;  %v1148_v4 = vld [vmem:[#allocation7 + $0x64] ss:$8 sps:$4 sm:$0xff]  }
  0x87   : > { %1032 = vmatprep.mubr.msk.bf16.mxu1 %vm1420_vm0, %v1419_v1  ;;  %513 = vmatprep.subr.bf16.mxu0 %v1145_v2  ;;  %v1150_v5 = vld [vmem:[#allocation7 + $0x60] ss:$8 sps:$4 sm:$0xff]   ;;  %v1151_v6 = vld [vmem:[#allocation7 + $0x54] ss:$8 sps:$4 sm:$0xff]   ;;  %v1153_v7 = vld [vmem:[#allocation7 + $0x50] ss:$8 sps:$4 sm:$0xff]  }
  0x88   : > { %514 = vmatpush1.bf16.msra.mxu0 %v1147_v3  ;;  %v1154_v8 = vld [vmem:[#allocation7 + $0x44] ss:$8 sps:$4 sm:$0xff]   ;;  %v1156_v9 = vld [vmem:[#allocation7 + $0x40] ss:$8 sps:$4 sm:$0xff]   ;;  %v1157_v11 = vld [vmem:[#allocation7 + $0x34] ss:$8 sps:$4 sm:$0xff]   ;;  %1017 = vmatpush3.bf16.msra.mxu1 %v1169_v10 }
  0x89   : > { %515 = vmatprep.subr.bf16.mxu0 %v1148_v4  ;;  %v1170_v12 = vld [vmem:[#allocation8 + $0x30] sm:$0xff]   ;;  %1018 = vmatprep.subr.bf16.mxu1 %v1419_v1  ;;  %v1160_v14 = vld [vmem:[#allocation7 + $0x24] ss:$8 sps:$4 sm:$0xff]   ;;  %v1162_v16 = vld [vmem:[#allocation7 + $0x20] ss:$8 sps:$4 sm:$0xff]   ;;  %v424_v48 = vshrl.u32 %v423_v47, 7 }
  0x8a   : > { %v1159_v13 = vld [vmem:[#allocation7 + $0x30] ss:$8 sps:$4 sm:$0xff]   ;;  %v1171_v15 = vld [vmem:[#allocation8 + $0x28] sm:$0xff]   ;;  %v1163_v17 = vld [vmem:[#allocation7 + $0x14] ss:$8 sps:$4 sm:$0xff]   ;;  %s995_s4 = sshll.u32 %s1488_s9, 7 }
  0x8b   : > { %v403_v18 = vld [vmem:[%s351_s18] sm:$0xff]  ;;  %v1172_v19 = vld [vmem:[#allocation8 + $0x20] sm:$0xff]   ;;  %v1175_v29 = vld [vmem:[#allocation8 + $0x8] sm:$0xff]   ;;  %v425_v49 = vsub.s32 0, %v424_v48  ;;  %s400_s15 = scalar_lea.vmem [#allocation11], %s1629_s29  ;;  %s820_s25 = scalar_lea.hbm %s1727_s8, %s995_s4 }
  0x8c   : > { %516 = vmatpush1.bf16.msra.mxu0 %v1150_v5  ;;  %1019 = vmatpush3.bf16.msra.mxu1 %v1170_v12  ;;  %v563_v20 = vmin.f32 %v403_v18, 30.0  ;;  %v1165_v21 = vld [vmem:[#allocation7 + $0x10] ss:$8 sps:$4 sm:$0xff]   ;;  %v1166_v22 = vld [vmem:[#allocation7 + $0x4] ss:$8 sps:$4 sm:$0xff]   ;;  %s822_s26 = sshll.u32 %s400_s15, 4  ;;  %s823_s26 = int_to_ptr.vmem [resolvable:$true] %s822_s26 }
  0x8d   : > { %517 = vmatprep.subr.bf16.mxu0 %v1151_v6  ;;  %1020 = vmatprep.subr.bf16.mxu1 %v1419_v1  ;;  %v1173_v24 = vld [vmem:[#allocation8 + $0x18] sm:$0xff]   ;;  %v1168_v25 = vld [vmem:[#allocation7] ss:$8 sps:$4 sm:$0xff]   ;;  %v1174_v27 = vld [vmem:[#allocation8 + $0x10] sm:$0xff]   ;;  %s1331_s2 = scalar_lea.vmem %s823_s26, 128  ;;  %p1754_p0 = scmp.ne.s32.totalorder %s1746_s24, 0 }
  0x8e   : > { %v564_v23 = vmul.f32 1.442695, %v563_v20  ;;  %v402_v26 = vld [vmem:[%s342_s17] sm:$0xff]  ;;  %v1177_v39 = vld [vmem:[#allocation10 + $0x38] sm:$0xff]   ;;  %v1178_v40 = vld [vmem:[#allocation10 + $0x30] sm:$0xff]   ;;  %s809_s17 = scalar_lea.sflag [#allocation4], %s1626_s6  ;;  %p1332_p3 = scmp.ne.s32.totalorder %s823_s26, %s1331_s2 }
  0x8f   : > { %v404_v28 = vpack.c.bf16 %v402_v26, %v402_v26  ;;  %v1176_v31 = vld [vmem:[#allocation8] sm:$0xff]   ;;  %v1179_v41 = vld [vmem:[#allocation10 + $0x28] sm:$0xff]   ;;  %v1181_v43 = vld [vmem:[#allocation10 + $0x18] sm:$0xff]   ;;  %s1421_s13 = smov [#allocation11]  }
  0x90   : > { %518 = vmatpush1.bf16.msra.mxu0 %v1153_v7  ;;  %1021 = vmatpush3.bf16.msra.mxu1 %v1171_v15  ;;  %1185 = vpow2.f32 %v564_v23  ;;  %v1180_v42 = vld [vmem:[#allocation10 + $0x20] sm:$0xff]   ;;  %v1182_v44 = vld [vmem:[#allocation10 + $0x10] sm:$0xff]   ;;  %v1183_v45 = vld [vmem:[#allocation10 + $0x8] sm:$0xff]   ;;  %p1333_p1 = pnand %p1332_p3, %p1754_p0  ;;  %s1335_s18 = sshll.u32 %s1421_s13, 4  ;;  %s1336_s18 = int_to_ptr.vmem [resolvable:$false] %s1335_s18 }
  0x91   : > { %519 = vmatprep.subr.bf16.mxu0 %v1154_v8  ;;  %1022 = vmatprep.subr.bf16.mxu1 %v1419_v1  ;;  %v1184_v46 = vld [vmem:[#allocation10] sm:$0xff]   ;;  %s1337_s9 = scalar_lea.vmem %s1336_s18, 256  ;;  %p1338_p5 = scmp.lt.s32.totalorder %s823_s26, %s1336_s18 }
  0x92   : > { %v421_v50 = vld [vmem:[%s1722_s3] sm:$0x3]  ;;  %p1334_p2 = pneg %p1333_p1  ;;  %p1339_p9 = scmp.lt.s32.totalorder %s1337_s9, %s1331_s2 }
  0x93   : > { %v426_v51 = vrot.slane %v421_v50, %v425_v49  ;;  %v976_v3 = vld [vmem:[%s1724_s5] ss:$0 sm:$0xff] }
  0x94   : > { %520 = vmatpush1.bf16.msra.mxu0 %v1156_v9  ;;  %1023 = vmatpush3.bf16.msra.mxu1 %v1172_v19  ;;  %v985_v10 = vld [vmem:[%s1726_s7] ss:$0 sm:$0xff]  ;;  %p1340_p12 = por %p1339_p9, %p1338_p5 }
  0x95   : > { %521 = vmatprep.subr.bf16.mxu0 %v1157_v11  ;;  %1024 = vmatprep.subr.bf16.mxu1 %v1419_v1 }
  0x96   : > { %p1341_p4 = pnand %p1340_p12, %p1334_p2 }
  0x98   : > { %522 = vmatpush1.bf16.msra.mxu0 %v1159_v13  ;;  %1025 = vmatpush3.bf16.msra.mxu1 %v1173_v24 }
  0x99   : > { %523 = vmatprep.subr.bf16.mxu0 %v1160_v14  ;;  %1026 = vmatprep.subr.bf16.mxu1 %v1419_v1 }
  0x9c   : > { %524 = vmatpush1.bf16.msra.mxu0 %v1162_v16  ;;  %1027 = vmatpush3.bf16.msra.mxu1 %v1174_v27 }
  0x9d   : > { %525 = vmatprep.subr.bf16.mxu0 %v1163_v17  ;;  %1028 = vmatprep.subr.bf16.mxu1 %v1419_v1  ;;  %v1186_v30 = vpop.eup %1185 }
  0x9e   : > { %v566_v32 = vadd.f32 2.0, %v1186_v30 }
  0xa0   : > { %526 = vmatpush1.bf16.msra.mxu0 %v1165_v21  ;;  %1029 = vmatpush3.bf16.msra.mxu1 %v1175_v29  ;;  %v567_v33 = vmul.f32 %v1186_v30, %v566_v32 }
  0xa1   : > { %527 = vmatprep.subr.bf16.mxu0 %v1166_v22  ;;  %1030 = vmatprep.subr.bf16.mxu1 %v1419_v1  ;;  %v429_v22 = vsub.s32 1, %v424_v48 }
  0xa2   : > { %v569_v34 = vadd.f32 2.0, %v567_v33  ;;  %v568_v35 = vmul.f32 %v567_v33, %v403_v18 }
  0xa3   : > { %v430_v23 = vrot.slane %v421_v50, %v429_v22 }
  0xa4   : > { %528 = vmatpush1.bf16.msra.mxu0 %v1168_v25  ;;  %1031 = vmatpush3.bf16.msra.mxu1 %v1176_v31  ;;  %1187 = vrcp.f32 %v569_v34 }
  0xa5   : > { %1036 = vmatprep.subr.bf16.mxu0 %v1419_v1 }
  0xa7   : > { %546 = vmatmul.mubr.bf16.vlgmr.msra.gmra.mxu0 %v404_v28 }
  0xa8   : > { %1052 = vmatprep.mubr.msk.bf16.mxu0 %vm1420_vm0, %v1419_v1  ;;  %1037 = vmatpush3.bf16.msra.mxu0 %v1177_v39 }
  0xa9   : > { %1038 = vmatprep.subr.bf16.mxu0 %v1419_v1 }
  0xac   : > { %1039 = vmatpush3.bf16.msra.mxu0 %v1178_v40 }
  0xad   : > { %1040 = vmatprep.subr.bf16.mxu0 %v1419_v1 }
  0xb0   : > { %1041 = vmatpush3.bf16.msra.mxu0 %v1179_v41 }
  0xb1   : > { %v1188_v36 = vpop.eup %1187  ;;  %1042 = vmatprep.subr.bf16.mxu0 %v1419_v1 }
  0xb2   : > { %v571_v37 = vmul.f32 %v1188_v36, %v568_v35 }
  0xb4   : > { %v572_v38 = vpack.c.bf16 %v571_v37, %v571_v37  ;;  %1043 = vmatpush3.bf16.msra.mxu0 %v1180_v42 }
  0xb5   : > { %1044 = vmatprep.subr.bf16.mxu0 %v1419_v1 }
  0xb6   : > { %1033 = vmatmul.mubr.bf16.vlgmr.msra.gmra.mxu1 %v572_v38 }
  0xb8   : > { %1045 = vmatpush3.bf16.msra.mxu0 %v1181_v43 }
  0xb9   : > { %1046 = vmatprep.subr.bf16.mxu0 %v1419_v1 }
  0xbc   : > { %1047 = vmatpush3.bf16.msra.mxu0 %v1182_v44 }
  0xbd   : > { %1048 = vmatprep.subr.bf16.mxu0 %v1419_v1 }
  0xc0   : > { %1049 = vmatpush3.bf16.msra.mxu0 %v1183_v45 }
  0xc1   : > { %1050 = vmatprep.subr.bf16.mxu0 %v1419_v1 }
  0xc4   : > { %1051 = vmatpush3.bf16.msra.mxu0 %v1184_v46 }
 0x167   : > { %v547_v52 = vpop.f32.mrf.mxu0 }
 0x168   : > { %v548_v53 = vadd.f32 %v547_v52, %v426_v51 }
 0x169   : > { %v549_v54 = vpop.f32.mrf.mxu0 }
 0x16a   : > { %v554_v55 = vmin.f32 %v548_v53, 30.0  ;;  %v550_v26 = vadd.f32 %v549_v54, %v430_v23 }
 0x16b   : > { %v551_v56 = vpop.f32.mrf.mxu0 }
 0x16c   : > { %v555_v57 = vmul.f32 1.442695, %v554_v55 }
 0x16d   : > { %v552_v58 = vpop.f32.mrf.mxu0 }
 0x16e   : > { %1189 = vpow2.f32 %v555_v57 }
 0x176   : > { %v678_v63 = vpop.f32.mrf.mxu1 }
 0x177   : > { %v679_v5 = vadd.f32 %v976_v3, %v678_v63 }
 0x178   : > { %v1034_v0 = vpop.f32.mrf.mxu1 }
 0x17a   : > { %v681_v1 = vpop.f32.mrf.mxu1 }
 0x17b   : > { %v1190_v59 = vpop.eup %1189 }
 0x17c   : > { %v557_v60 = vadd.f32 2.0, %v1190_v59  ;;  %v1035_v2 = vpop.f32.mrf.mxu1 }
 0x17e   : > { %v558_v61 = vmul.f32 %v1190_v59, %v557_v60 }
 0x180   : > { %v560_v62 = vadd.f32 2.0, %v558_v61  ;;  %v559_v4 = vmul.f32 %v558_v61, %v548_v53 }
 0x182   : > { %1191 = vrcp.f32 %v560_v62 }
 0x18f   : > { %v1192_v6 = vpop.eup %1191 }
 0x190   : > { %v562_v7 = vmul.f32 %v1192_v6, %v559_v4 }
 0x192   : > { %v684_v8 = vadd.f32 %v679_v5, %v562_v7 }
 0x194   : > { %v685_v9 = vpack.c.bf16 %v684_v8, %v684_v8 }
 0x196   : > { %1053 = vmatmul.mubr.bf16.vlgmr.msra.gmra.mxu0 %v685_v9 }
 0x256   : > { %v791_v11 = vpop.f32.mrf.mxu0 }
 0x257   : > { %v792_v12 = vadd.f32 %v985_v10, %v791_v11 }
 0x258   : > { %v1054_v13 = vpop.f32.mrf.mxu0 }
 0x259   : > { %v797_v14 = vmin.f32 %v792_v12, 30.0 }
 0x25a   : > { %v794_v15 = vpop.f32.mrf.mxu0 }
 0x25b   : > { %v798_v16 = vmul.f32 1.442695, %v797_v14 }
 0x25c   : > { %v1055_v17 = vpop.f32.mrf.mxu0 }
 0x25d   : > { %1193 = vpow2.f32 %v798_v16 }
 0x26a   : > { %v1194_v18 = vpop.eup %1193 }
 0x26b   : > { %v800_v19 = vadd.f32 2.0, %v1194_v18 }
 0x26d   : > { %v801_v20 = vmul.f32 %v1194_v18, %v800_v19 }
 0x26f   : > { %v803_v21 = vadd.f32 2.0, %v801_v20  ;;  %v802_v24 = vmul.f32 %v801_v20, %v792_v12 }
 0x271   : > { %1195 = vrcp.f32 %v803_v21 }
 0x27e   : > { %v1196_v25 = vpop.eup %1195 }
 0x27f   : > { %v805_v27 = vmul.f32 %v1196_v25, %v802_v24 }
 0x281   : > { %v806_v28 = vadd.f32 %v805_v27, %v550_v26 }
 0x283   : > { %807 = vst [vmem:[%s400_s15] sm:$0xff] %v806_v28 }
 0x284   : > { %1344 = shalt.err (!%p1341_p4)
}
 0x285   : > { %s1345_s29 = scalar_lea.hbm %s820_s25, 128  ;;  %s1349_s16 = scalar_lea.hbm %s1727_s8, 384 }
 0x286   : > { %p1346_p8 = scmp.ne.s32.totalorder %s820_s25, %s1345_s29  ;;  %p1350_p6 = scmp.lt.s32.totalorder %s820_s25, %s1727_s8 }
 0x287   : > { %p1351_p11 = scmp.lt.s32.totalorder %s1349_s16, %s1345_s29 }
 0x288   : > { %p1347_p7 = pnand %p1346_p8, %p1754_p0 }
 0x289   : > { %p1352_p13 = por %p1351_p11, %p1350_p6 }
 0x28a   : > { %p1348_p10 = pneg %p1347_p7 }
 0x28c   : > { %p1353_p3 = pnand %p1352_p13, %p1348_p10 }
 0x28e   : > { %1356 = shalt.err (!%p1353_p3)
}
 0x28f   : > { %1072 = dma.vmem_to_hbm [thread:$0]  (%p1754_p0), %s823_s26, 128, %s820_s25, %s809_s17  }
 0x290 PF: > { %p1102_p1 = scmp.ge.s32.totalorder %s1407_s30, 2  ;;  %s834_s14 = sand.u32 1, %s1395_s27  }
 0x291   : > { %p1755_p2 = scmp.ne.s32.totalorder %s1738_s12, 0  ;;  %s835_s22 = scalar_lea.sflag [#allocation4], %s834_s14 }
 0x293   : > { %p1092_p5 = pnand %p1102_p1, %p1755_p2 }
 0x295   : > { %p1093_p9 = pneg %p1092_p5 }
 0x297   : > { %1390 = dma.done.wait (%p1093_p9), %s835_s22, 128  }
 0x298   : > { %1392 = vsyncadd (%p1093_p9), %s835_s22, 4294967168  ;;  %s1756_s4 = sld [smem:[#allocation17_spill]]  ;;  %p25_p12 = scmp.ge.s32.totalorder %s1538_s19, 5  }
 0x299   : > { %s1757_s29 = sld [smem:[#allocation18_spill]]  ;;  %s1758_s27 = smov %s1399_s28 }
 0x29a   : > { %s1760_s30 = smov %s1538_s19  ;;  %27 = sbr.rel (!%p25_p12) target bundleno = 12 (0xc), region = 122 }
 0x29e   : > { %s1759_s28 = smov %s1756_s4 }
 0x29f   :  { %840 = vsyncpa [#allocation3], 1 }
 0x2a0   :  { %842 = vsyncpa [#allocation3 + $0x1], 1 }
 0x2a1   :  { %843 = vsyncpa [#allocation6], 1 }
 0x2a2   :  { %845 = vsyncpa [#allocation6 + $0x1], 1 }
 0x2a3   :  { %846 = vsyncpa [#allocation9], 1 }
 0x2a4   :  { %847 = vsyncpa [#allocation4], 1 }
 0x2a5   :  { %849 = vsyncpa [#allocation4 + $0x1], 1 }

</bundles_post_ra>
